<compile_context>
chip_gen: v7x
topology: tpu7x:2x2x1
jax: 0.10.0
libtpu: 0.0.40
codegen_flags: <defaults>
</compile_context>

<pallas_src>
import functools

import jax
import jax.numpy as jnp
from jax.experimental import pallas as pl
from jax.experimental.pallas import tpu as pltpu


def _round_up(x, m):
    return (x + m - 1) // m * m


def _mlp_kernel(x_ref, w1_ref, b1_ref, w2_ref, b2_ref, w3_ref, b3_ref,
                w4t_ref, b4_ref, o_ref):
    # fc1: [TB,32] @ [32,64]  (bf16 operands, f32 accumulation on the MXU).
    x = x_ref[...].astype(jnp.bfloat16)
    h = jnp.dot(x, w1_ref[...], preferred_element_type=jnp.float32) + b1_ref[...]
    h = jnp.maximum(h, 0.0)

    # fc2: [TB,64] @ [64,30]
    h = jnp.dot(h.astype(jnp.bfloat16), w2_ref[...],
                preferred_element_type=jnp.float32) + b2_ref[...]
    h = jnp.maximum(h, 0.0)

    # fc3: [TB,30] @ [30,10]
    h = jnp.dot(h.astype(jnp.bfloat16), w3_ref[...],
                preferred_element_type=jnp.float32) + b3_ref[...]
    h = jnp.maximum(h, 0.0)                     # (TB, 10) f32

    # fc4 (K=10, N=2): done on VPU/XLU (broadcast multiply + lane reduction), all f32.
    w4t = w4t_ref[...]                          # (2, 10) f32
    b4 = b4_ref[...]                            # (1, 2)  f32
    l0 = jnp.sum(h * w4t[0:1, :], axis=-1, keepdims=True) + b4[:, 0:1]   # (TB, 1)
    l1 = jnp.sum(h * w4t[1:2, :], axis=-1, keepdims=True) + b4[:, 1:2]   # (TB, 1)

    # 2-class log_softmax over dim=1, in f32 (max via jnp.maximum -> pure VPU/EUP).
    m = jnp.maximum(l0, l1)
    lse = m + jnp.log(jnp.exp(l0 - m) + jnp.exp(l1 - m))
    o_ref[...] = jnp.concatenate([l0 - lse, l1 - lse], axis=-1).astype(o_ref.dtype)


@functools.partial(jax.jit, static_argnames=("tb",))
def mlp_forward(x, params, *, tb=256):
    """params: w_i stored as [in, out] f32, b_i as [1, out] f32."""
    batch, feat = x.shape
    # Batch tile: multiple of 8, aim for >=256 rows (MXU M fill), cap at 2048 (vreg pressure).
    tb = min(tb, 2048, _round_up(batch, 8))
    padded = _round_up(batch, tb)
    xp = jnp.pad(x, ((0, padded - batch), (0, 0))) if padded != batch else x

    # bf16 matmul operands (f32 accumulation in-kernel); fc4 stays f32 on the VPU and is
    # passed pre-transposed as (2, 10) so its rows broadcast against h.
    w1 = params["w1"].astype(jnp.bfloat16)
    w2 = params["w2"].astype(jnp.bfloat16)
    w3 = params["w3"].astype(jnp.bfloat16)
    w4t = jnp.transpose(params["w4"]).astype(jnp.float32)
    b1, b2, b3, b4 = params["b1"], params["b2"], params["b3"], params["b4"]

    operands = (xp, w1, b1, w2, b2, w3, b3, w4t, b4)

    def resident(shape):
        # Whole-array block at a constant block index -> stays VMEM-resident across steps.
        return pl.BlockSpec(shape, lambda i: (0,) * len(shape))

    in_specs = [pl.BlockSpec((tb, feat), lambda i: (i, 0))]
    in_specs += [resident(op.shape) for op in operands[1:]]
    out_specs = pl.BlockSpec((tb, 2), lambda i: (i, 0))

    out = pl.pallas_call(
        _mlp_kernel,
        out_shape=jax.ShapeDtypeStruct((padded, 2), jnp.float32),
        grid=(padded // tb,),
        in_specs=in_specs,
        out_specs=out_specs,
        compiler_params=pltpu.CompilerParams(
            dimension_semantics=("parallel",)),
    )(*operands)
    return out[:batch]


def init_params(key, input_shape):
    """Deterministic init mimicking nn.Linear (uniform ±1/sqrt(fan_in)); w stored [in, out]."""
    dims = [(input_shape, 64), (64, 30), (30, 10), (10, 2)]
    params = {}
    for i, (fan_in, fan_out) in enumerate(dims, start=1):
        key, kw, kb = jax.random.split(key, 3)
        bound = 1.0 / jnp.sqrt(jnp.float32(fan_in))
        params[f"w{i}"] = jax.random.uniform(
            kw, (fan_in, fan_out), jnp.float32, -bound, bound)
        params[f"b{i}"] = jax.random.uniform(
            kb, (1, fan_out), jnp.float32, -bound, bound)
    return params


def reference_forward(x, params):
    """Pure-JAX reference mirroring the kernel's bf16-operand / f32-accumulate matmuls."""
    def dot_bf16(a, w):
        return jnp.dot(a.astype(jnp.bfloat16), w.astype(jnp.bfloat16),
                       preferred_element_type=jnp.float32)
    h = jnp.maximum(dot_bf16(x, params["w1"]) + params["b1"], 0.0)
    h = jnp.maximum(dot_bf16(h, params["w2"]) + params["b2"], 0.0)
    h = jnp.maximum(dot_bf16(h, params["w3"]) + params["b3"], 0.0)
    logits = jnp.dot(h, params["w4"], preferred_element_type=jnp.float32) + params["b4"]
    return jax.nn.log_softmax(logits, axis=1)


if __name__ == "__main__":
    key = jax.random.PRNGKey(0)
    k_params, k_x1, k_x2 = jax.random.split(key, 3)

    input_shape = 32
    params = init_params(k_params, input_shape)

    # Small shape consistent with the module (single grid step).
    x_small = jax.random.normal(k_x1, (8, input_shape), jnp.float32)
    out_small = jax.block_until_ready(mlp_forward(x_small, params))
    ref_small = reference_forward(x_small, params)
    assert out_small.shape == (8, 2)
    assert jnp.allclose(out_small, ref_small, atol=3e-3, rtol=3e-3)

    # Exercise the tiled, batch-parallel grid path (2 steps of TB=256).
    x_big = jax.random.normal(k_x2, (512, input_shape), jnp.float32)
    out_big = jax.block_until_ready(mlp_forward(x_big, params))
    ref_big = reference_forward(x_big, params)
    assert out_big.shape == (512, 2)
    assert jnp.allclose(out_big, ref_big, atol=3e-3, rtol=3e-3)

    print("KERNEL_OK")
</pallas_src>

<mosaic_0001>
module attributes {stable_mosaic.version = 11 : i64} {
  func.func @_mlp_kernel(%arg0: i32, %arg1: memref<8x32xf32, #tpu.memory_space<vmem>>, %arg2: memref<32x64xbf16, #tpu.memory_space<vmem>>, %arg3: memref<1x64xf32, #tpu.memory_space<vmem>>, %arg4: memref<64x30xbf16, #tpu.memory_space<vmem>>, %arg5: memref<1x30xf32, #tpu.memory_space<vmem>>, %arg6: memref<30x10xbf16, #tpu.memory_space<vmem>>, %arg7: memref<1x10xf32, #tpu.memory_space<vmem>>, %arg8: memref<2x10xf32, #tpu.memory_space<vmem>>, %arg9: memref<1x2xf32, #tpu.memory_space<vmem>>, %arg10: memref<8x2xf32, #tpu.memory_space<vmem>>) attributes {dimension_semantics = [#tpu.dimension_semantics<parallel>], iteration_bounds = array<i64: 1>, scalar_prefetch = 0 : i64, scratch_operands = 0 : i64, tpu.core_type = #tpu.core_type<tc>, window_params = [{transform_indices = @transform_0, window_bounds = array<i64: 8, 32>}, {pipeline_mode = #tpu.pipeline_mode<synchronous>, transform_indices = @transform_1, window_bounds = array<i64: 32, 64>}, {pipeline_mode = #tpu.pipeline_mode<synchronous>, transform_indices = @transform_2, window_bounds = array<i64: 1, 64>}, {pipeline_mode = #tpu.pipeline_mode<synchronous>, transform_indices = @transform_3, window_bounds = array<i64: 64, 30>}, {pipeline_mode = #tpu.pipeline_mode<synchronous>, transform_indices = @transform_4, window_bounds = array<i64: 1, 30>}, {pipeline_mode = #tpu.pipeline_mode<synchronous>, transform_indices = @transform_5, window_bounds = array<i64: 30, 10>}, {pipeline_mode = #tpu.pipeline_mode<synchronous>, transform_indices = @transform_6, window_bounds = array<i64: 1, 10>}, {pipeline_mode = #tpu.pipeline_mode<synchronous>, transform_indices = @transform_7, window_bounds = array<i64: 2, 10>}, {pipeline_mode = #tpu.pipeline_mode<synchronous>, transform_indices = @transform_8, window_bounds = array<i64: 1, 2>}, {transform_indices = @transform_9, window_bounds = array<i64: 8, 2>}]} {
    %c0 = arith.constant 0 : index
    %c0_0 = arith.constant 0 : index
    %0 = vector.load %arg1[%c0, %c0_0] : memref<8x32xf32, #tpu.memory_space<vmem>>, vector<8x32xf32>
    %1 = arith.truncf %0 : vector<8x32xf32> to vector<8x32xbf16>
    %c0_1 = arith.constant 0 : index
    %c0_2 = arith.constant 0 : index
    %2 = vector.load %arg2[%c0_1, %c0_2] : memref<32x64xbf16, #tpu.memory_space<vmem>>, vector<32x64xbf16>
    %cst = arith.constant dense<0.000000e+00> : vector<8x64xf32>
    %3 = tpu.matmul %1, %2, %cst {dimension_numbers = #tpu.dot_dimension_numbers<[1], [0], [0], [1], [0, 0, 1, 1], [], []>} : vector<8x32xbf16>, vector<32x64xbf16>, vector<8x64xf32> -> vector<8x64xf32>
    %c0_3 = arith.constant 0 : index
    %c0_4 = arith.constant 0 : index
    %4 = vector.load %arg3[%c0_3, %c0_4] : memref<1x64xf32, #tpu.memory_space<vmem>>, vector<1x64xf32>
    %5 = vector.broadcast %4 : vector<1x64xf32> to vector<8x64xf32>
    %6 = arith.addf %3, %5 : vector<8x64xf32>
    %cst_5 = arith.constant 0.000000e+00 : f32
    %7 = vector.broadcast %cst_5 : f32 to vector<8x64xf32>
    %8 = arith.maximumf %6, %7 : vector<8x64xf32>
    %9 = arith.truncf %8 : vector<8x64xf32> to vector<8x64xbf16>
    %c0_6 = arith.constant 0 : index
    %c0_7 = arith.constant 0 : index
    %10 = vector.load %arg4[%c0_6, %c0_7] : memref<64x30xbf16, #tpu.memory_space<vmem>>, vector<64x30xbf16>
    %cst_8 = arith.constant dense<0.000000e+00> : vector<8x30xf32>
    %11 = tpu.matmul %9, %10, %cst_8 {dimension_numbers = #tpu.dot_dimension_numbers<[1], [0], [0], [1], [0, 0, 1, 1], [], []>} : vector<8x64xbf16>, vector<64x30xbf16>, vector<8x30xf32> -> vector<8x30xf32>
    %c0_9 = arith.constant 0 : index
    %c0_10 = arith.constant 0 : index
    %12 = vector.load %arg5[%c0_9, %c0_10] : memref<1x30xf32, #tpu.memory_space<vmem>>, vector<1x30xf32>
    %13 = vector.broadcast %12 : vector<1x30xf32> to vector<8x30xf32>
    %14 = arith.addf %11, %13 : vector<8x30xf32>
    %cst_11 = arith.constant 0.000000e+00 : f32
    %15 = vector.broadcast %cst_11 : f32 to vector<8x30xf32>
    %16 = arith.maximumf %14, %15 : vector<8x30xf32>
    %17 = arith.truncf %16 : vector<8x30xf32> to vector<8x30xbf16>
    %c0_12 = arith.constant 0 : index
    %c0_13 = arith.constant 0 : index
    %18 = vector.load %arg6[%c0_12, %c0_13] : memref<30x10xbf16, #tpu.memory_space<vmem>>, vector<30x10xbf16>
    %cst_14 = arith.constant dense<0.000000e+00> : vector<8x10xf32>
    %19 = tpu.matmul %17, %18, %cst_14 {dimension_numbers = #tpu.dot_dimension_numbers<[1], [0], [0], [1], [0, 0, 1, 1], [], []>} : vector<8x30xbf16>, vector<30x10xbf16>, vector<8x10xf32> -> vector<8x10xf32>
    %c0_15 = arith.constant 0 : index
    %c0_16 = arith.constant 0 : index
    %20 = vector.load %arg7[%c0_15, %c0_16] : memref<1x10xf32, #tpu.memory_space<vmem>>, vector<1x10xf32>
    %21 = vector.broadcast %20 : vector<1x10xf32> to vector<8x10xf32>
    %22 = arith.addf %19, %21 : vector<8x10xf32>
    %cst_17 = arith.constant 0.000000e+00 : f32
    %23 = vector.broadcast %cst_17 : f32 to vector<8x10xf32>
    %24 = arith.maximumf %22, %23 : vector<8x10xf32>
    %c0_18 = arith.constant 0 : index
    %c0_19 = arith.constant 0 : index
    %25 = vector.load %arg8[%c0_18, %c0_19] : memref<2x10xf32, #tpu.memory_space<vmem>>, vector<2x10xf32>
    %c0_20 = arith.constant 0 : index
    %c0_21 = arith.constant 0 : index
    %26 = vector.load %arg9[%c0_20, %c0_21] : memref<1x2xf32, #tpu.memory_space<vmem>>, vector<1x2xf32>
    %27 = vector.extract_strided_slice %25 {offsets = [0, 0], sizes = [1, 10], strides = [1, 1]} : vector<2x10xf32> to vector<1x10xf32>
    %28 = vector.broadcast %27 : vector<1x10xf32> to vector<8x10xf32>
    %29 = arith.mulf %24, %28 : vector<8x10xf32>
    %cst_22 = arith.constant dense<0.000000e+00> : vector<8xf32>
    %30 = vector.multi_reduction <add>, %29, %cst_22 [1] : vector<8x10xf32> to vector<8xf32>
    %31 = vector.shape_cast %30 : vector<8xf32> to vector<8x1xf32>
    %32 = vector.extract_strided_slice %26 {offsets = [0, 0], sizes = [1, 1], strides = [1, 1]} : vector<1x2xf32> to vector<1x1xf32>
    %33 = vector.broadcast %32 : vector<1x1xf32> to vector<8x1xf32>
    %34 = arith.addf %31, %33 : vector<8x1xf32>
    %35 = vector.extract_strided_slice %25 {offsets = [1, 0], sizes = [1, 10], strides = [1, 1]} : vector<2x10xf32> to vector<1x10xf32>
    %36 = vector.broadcast %35 : vector<1x10xf32> to vector<8x10xf32>
    %37 = arith.mulf %24, %36 : vector<8x10xf32>
    %cst_23 = arith.constant dense<0.000000e+00> : vector<8xf32>
    %38 = vector.multi_reduction <add>, %37, %cst_23 [1] : vector<8x10xf32> to vector<8xf32>
    %39 = vector.shape_cast %38 : vector<8xf32> to vector<8x1xf32>
    %40 = vector.extract_strided_slice %26 {offsets = [0, 1], sizes = [1, 1], strides = [1, 1]} : vector<1x2xf32> to vector<1x1xf32>
    %41 = vector.broadcast %40 : vector<1x1xf32> to vector<8x1xf32>
    %42 = arith.addf %39, %41 : vector<8x1xf32>
    %43 = arith.maximumf %34, %42 : vector<8x1xf32>
    %44 = arith.subf %34, %43 : vector<8x1xf32>
    %45 = math.exp %44 : vector<8x1xf32>
    %46 = arith.subf %42, %43 : vector<8x1xf32>
    %47 = math.exp %46 : vector<8x1xf32>
    %48 = arith.addf %45, %47 : vector<8x1xf32>
    %49 = math.log %48 : vector<8x1xf32>
    %50 = arith.addf %43, %49 : vector<8x1xf32>
    %51 = arith.subf %34, %50 : vector<8x1xf32>
    %52 = arith.subf %42, %50 : vector<8x1xf32>
    %53 = tpu.concatenate %51, %52 in 1 : vector<8x1xf32>, vector<8x1xf32> -> vector<8x2xf32>
    %c0_24 = arith.constant 0 : index
    %c0_25 = arith.constant 0 : index
    %54 = vector.load %arg10[%c0_24, %c0_25] : memref<8x2xf32, #tpu.memory_space<vmem>>, vector<8x2xf32>
    tpu.vector_store %arg10[%c0_24, %c0_25], %53 {strides = array<i32>} : memref<8x2xf32, #tpu.memory_space<vmem>>, vector<8x2xf32>,
    return
  }
  func.func @transform_0(%arg0: i32) -> (i32, i32) {
    %c0_i32 = arith.constant 0 : i32
    %c0_i32_0 = arith.constant 0 : i32
    return %arg0, %c0_i32 : i32, i32
  }
  func.func @transform_1(%arg0: i32) -> (i32, i32) {
    %c0_i32 = arith.constant 0 : i32
    %c0_i32_0 = arith.constant 0 : i32
    %c0_i32_1 = arith.constant 0 : i32
    return %c0_i32, %c0_i32_0 : i32, i32
  }
  func.func @transform_2(%arg0: i32) -> (i32, i32) {
    %c0_i32 = arith.constant 0 : i32
    %c0_i32_0 = arith.constant 0 : i32
    %c0_i32_1 = arith.constant 0 : i32
    return %c0_i32, %c0_i32_0 : i32, i32
  }
  func.func @transform_3(%arg0: i32) -> (i32, i32) {
    %c0_i32 = arith.constant 0 : i32
    %c0_i32_0 = arith.constant 0 : i32
    %c0_i32_1 = arith.constant 0 : i32
    return %c0_i32, %c0_i32_0 : i32, i32
  }
  func.func @transform_4(%arg0: i32) -> (i32, i32) {
    %c0_i32 = arith.constant 0 : i32
    %c0_i32_0 = arith.constant 0 : i32
    %c0_i32_1 = arith.constant 0 : i32
    return %c0_i32, %c0_i32_0 : i32, i32
  }
  func.func @transform_5(%arg0: i32) -> (i32, i32) {
    %c0_i32 = arith.constant 0 : i32
    %c0_i32_0 = arith.constant 0 : i32
    %c0_i32_1 = arith.constant 0 : i32
    return %c0_i32, %c0_i32_0 : i32, i32
  }
  func.func @transform_6(%arg0: i32) -> (i32, i32) {
    %c0_i32 = arith.constant 0 : i32
    %c0_i32_0 = arith.constant 0 : i32
    %c0_i32_1 = arith.constant 0 : i32
    return %c0_i32, %c0_i32_0 : i32, i32
  }
  func.func @transform_7(%arg0: i32) -> (i32, i32) {
    %c0_i32 = arith.constant 0 : i32
    %c0_i32_0 = arith.constant 0 : i32
    %c0_i32_1 = arith.constant 0 : i32
    return %c0_i32, %c0_i32_0 : i32, i32
  }
  func.func @transform_8(%arg0: i32) -> (i32, i32) {
    %c0_i32 = arith.constant 0 : i32
    %c0_i32_0 = arith.constant 0 : i32
    %c0_i32_1 = arith.constant 0 : i32
    return %c0_i32, %c0_i32_0 : i32, i32
  }
  func.func @transform_9(%arg0: i32) -> (i32, i32) {
    %c0_i32 = arith.constant 0 : i32
    %c0_i32_0 = arith.constant 0 : i32
    return %arg0, %c0_i32 : i32, i32
  }
}

</mosaic_0001>

<bundles_post_ra>
// kernel: mlp_forward.1
= control target key start
LH: loop header
LB: loop body
LE: loop exit
PB: predicated region body
PF: predicated region fallthrough
CT: control target
= control target key end

     0   :  { %v396_v0 = vmov 0.0   ;;  %vm397_vm0 = vmmov 0   ;;  %vm58_vm1 = vcmask 261120   ;;  %vm143_vm2 = vcmask 523264   ;;  %s399_s30 = smov 1   ;;  %s498_s1 = inlined_call_operand.vmem [shape: bf16[32,64], index: 1, kind: input, shape index: {}]   ;;  %s499_s0 = inlined_call_operand.vmem [shape: f32[8,32], index: 0, kind: input, shape index: {}]   ;;  %s500_s3 = inlined_call_operand.vmem [shape: bf16[64,30], index: 3, kind: input, shape index: {}]   ;;  %s501_s5 = inlined_call_operand.vmem [shape: bf16[30,10], index: 5, kind: input, shape index: {}]   ;;  %s502_s2 = inlined_call_operand.vmem [shape: f32[1,64], index: 2, kind: input, shape index: {}]   ;;  %s503_s4 = inlined_call_operand.vmem [shape: f32[1,30], index: 4, kind: input, shape index: {}]   ;;  %s504_s6 = inlined_call_operand.vmem [shape: f32[1,10], index: 6, kind: input, shape index: {}]   ;;  %s505_s7 = inlined_call_operand.vmem [shape: f32[2,10], index: 7, kind: input, shape index: {}]   ;;  %s506_s8 = inlined_call_operand.vmem [shape: f32[1,2], index: 8, kind: input, shape index: {}]   ;;  %s507_s9 = inlined_call_operand.vmem [shape: f32[8,2], index: 9, kind: output, shape index: {}]  }
   0x1   :  { %350 = vmatprep.subr.bf16.mxu0 %v396_v0  ;;  %v382_v1 = vld [vmem:[%s498_s1] sm:$0xff]   ;;  %354 = vmatprep.mubr.msk.bf16.mxu0 %vm397_vm0, %v396_v0  ;;  %v383_v2 = vld [vmem:[%s498_s1 + $0x8] sm:$0xff]   ;;  %v386_v7 = vld [vmem:[%s500_s3 + $0x10] sm:$0xff]   ;;  %vm215_vm3 = vcmask 1046528   ;;  %vm211_vm4 = vcmask 244736   ;;  %v262_v28 = vlaneseq  ;;  %vm267_vm5 = vcmask 80896  }
   0x2   :  { %358 = vmatprep.subr.bf16.mxu1 %v396_v0  ;;  %366 = vmatprep.mubr.msk.bf16.mxu1 %vm397_vm0, %v396_v0  ;;  %v33_v3 = vld [vmem:[%s499_s0] sm:$0xff]  ;;  %v385_v5 = vld [vmem:[%s500_s3 + $0x8] sm:$0xff]   ;;  %v387_v8 = vld [vmem:[%s500_s3 + $0x18] sm:$0xff]   ;;  %vm316_vm6 = vcmask 7168   ;;  %vm318_vm7 = vcmask 15360  }
   0x3   :  { %351 = vmatpush3.bf16.msra.mxu0 %v382_v1  ;;  %v384_v4 = vld [vmem:[%s500_s3] sm:$0xff]   ;;  %v34_v6 = vpack.c.bf16 %v33_v3, %v33_v3  ;;  %v389_v18 = vld [vmem:[%s501_s5 + $0x8] sm:$0x7f]   ;;  %v263_v29 = vshrl.u32 %v262_v28, 7 }
   0x4   :  { %352 = vmatprep.subr.bf16.mxu0 %v396_v0  ;;  %359 = vmatpush3.bf16.msra.mxu1 %v384_v4  ;;  %v388_v9 = vld [vmem:[%s501_s5] sm:$0xff]   ;;  %v217_v19 = vsel %vm215_vm3, %v389_v18, 0 }
   0x5   :  { %360 = vmatprep.subr.bf16.mxu1 %v396_v0  ;;  %v324_v10 = vld [vmem:[%s502_s2] ss:$0 sm:$0xff]  ;;  %v280_v30 = vsub.s32 1, %v263_v29  ;;  %v264_v33 = vsub.s32 0, %v263_v29 }
   0x6   :  { %v328_v20 = vld [vmem:[%s503_s4] ss:$0 sm:$0xff] }
   0x7   :  { %353 = vmatpush3.bf16.msra.mxu0 %v383_v2  ;;  %v334_v31 = vld [vmem:[%s504_s6] ss:$0 sm:$0xff] }
   0x8   :  { %370 = vmatprep.subr.bf16.mxu0 %v396_v0  ;;  %361 = vmatpush3.bf16.msra.mxu1 %v385_v5  ;;  %v260_v32 = vld [vmem:[%s505_s7] sm:$0x3]  ;;  %s398_s7 = smov 127  }
   0x9   :  { %362 = vmatprep.subr.bf16.mxu1 %v396_v0  ;;  %v281_v37 = vrot.slane %v260_v32, %v280_v30  ;;  %v265_v41 = vrot.slane %v260_v32, %v264_v33  ;;  %v338_v46 = vld [vmem:[%s506_s8] ss:$0 sm:$0xff] }
   0xa   :  { %355 = vmatmul.mubr.msk.bf16.vlgmr.msra.gmra.mrb[0].mxu0 %vm58_vm1, %v34_v6 }
   0xb   :  { %374 = vmatprep.mubr.msk.bf16.mxu0 %vm397_vm0, %v396_v0  ;;  %371 = vmatpush3.bf16.msra.mxu0 %v388_v9 }
   0xc   :  { %363 = vmatpush3.bf16.msra.mxu1 %v386_v7  ;;  %372 = vmatprep.subr.bf16.mxu0 %v396_v0 }
   0xd   :  { %364 = vmatprep.subr.bf16.mxu1 %v396_v0 }
   0xf   :  { %373 = vmatpush3.bf16.msra.mxu0 %v217_v19 }
  0x10   :  { %365 = vmatpush3.bf16.msra.mxu1 %v387_v8 }
  0xdd   :  { %v96_v11 = vpop.f32.mrb[0].mxu0 }
  0xde   :  { %v97_v12 = vadd.f32 %v324_v10, %v96_v11  ;;  %v356_v13 = vpop.f32.mrb[1].mxu0 }
  0xdf   :  { %v99_v14 = vpop.f32.mrb[2].mxu0 }
  0xe0   :  { %v102_v15 = vmax.f32 %v97_v12, 0.0  ;;  %v357_v16 = vpop.f32.mrb[3].mxu0 }
  0xe2   :  { %v103_v17 = vpack.c.bf16 %v102_v15, %v102_v15 }
  0xe4   :  { %367 = vmatmul.mubr.msk.bf16.vlgmr.msra.gmra.mrb[0].mxu1 %vm143_vm2, %v103_v17 }
 0x1b7   :  { %v181_v21 = vpop.f32.mrb[0].mxu1 }
 0x1b8   :  { %v182_v22 = vadd.f32 %v328_v20, %v181_v21  ;;  %v368_v23 = vpop.f32.mrb[1].mxu1 }
 0x1b9   :  { %v184_v24 = vpop.f32.mrb[2].mxu1 }
 0x1ba   :  { %v187_v25 = vmax.f32 %v182_v22, 0.0  ;;  %v369_v26 = vpop.f32.mrb[3].mxu1 }
 0x1bc   :  { %v188_v27 = vpack.c.bf16 %v187_v25, %v187_v25 }
 0x1be   :  { %375 = vmatmul.mubr.msk.bf16.vlgmr.msra.gmra.mrb[4].mxu0 %vm211_vm4, %v188_v27 }
 0x291   :  { %v253_v34 = vpop.f32.mrb[4].mxu0 }
 0x292   :  { %v254_v35 = vadd.f32 %v334_v31, %v253_v34  ;;  %v376_v36 = vpop.f32.mrb[5].mxu0 }
 0x293   :  { %v256_v38 = vpop.f32.mrb[6].mxu0 }
 0x294   :  { %v259_v39 = vmax.f32 %v254_v35, 0.0  ;;  %v377_v40 = vpop.f32.mrb[7].mxu0 }
 0x296   :  { %v282_v42 = vmul.f32 %v281_v37, %v259_v39  ;;  %v266_v44 = vmul.f32 %v265_v41, %v259_v39 }
 0x298   :  { %v283_v43 = vsel %vm267_vm5, %v282_v42, 0.0  ;;  %v268_v45 = vsel %vm267_vm5, %v266_v44, 0.0 }
 0x299   :  { %284 = vadd.xlane.f32.xlu0 %v283_v43 }
 0x29d   :  { %269 = vadd.xlane.f32.xlu0 %v268_v45 }
 0x326   :  { %v285_v47 = vpop.xlane.xlu0 %284 }
 0x327   :  { %v286_v48 = vadd.f32 %v338_v46, %v285_v47 }
 0x329   :  { %288 = vrot.lane.b32.xlu1 %v286_v48, %s398_s7 }
 0x32a   :  { %v270_v49 = vpop.xlane.xlu0 %269 }
 0x32b   :  { %v277_v50 = vadd.f32 %v338_v46, %v270_v49 }
 0x39b   :  { %v289_v51 = vpop.permute.xlu1 %288 }
 0x39c   :  { %v291_v52 = vmax.f32 %v277_v50, %v289_v51 }
 0x39e   :  { %296 = vrot.lane.b32.xlu1 %v291_v52, %s399_s30  ;;  %v292_v57 = vsub.f32 %v277_v50, %v291_v52 }
 0x3a0   :  { %v293_v58 = vmul.f32 1.442695, %v292_v57 }
 0x410   :  { %v297_v53 = vpop.permute.xlu1 %296 }
 0x411   :  { %v299_v54 = vsub.f32 %v286_v48, %v297_v53 }
 0x413   :  { %v300_v55 = vmul.f32 1.442695, %v299_v54 }
 0x415   :  { %390 = vpow2.f32 %v300_v55 }
 0x416   :  { %392 = vpow2.f32 %v293_v58 }
 0x41f   :  { %v391_v56 = vpop.eup %390 }
 0x420   :  { %303 = vrot.lane.b32.xlu0 %v391_v56, %s398_s7  ;;  %v393_v59 = vpop.eup %392 }
 0x492   :  { %v304_v60 = vpop.permute.xlu0 %303 }
 0x493   :  { %v306_v61 = vadd.f32 %v393_v59, %v304_v60 }
 0x495   :  { %394 = vlog2.f32 %v306_v61 }
 0x49f   :  { %v395_v62 = vpop.eup %394 }
 0x4a0   :  { %v308_v63 = vmul.f32 0.6931472, %v395_v62 }
 0x4a2   :  { %v309_v0 = vadd.f32 %v308_v63, %v291_v52 }
 0x4a4   :  { %312 = vrot.lane.b32.xlu1 %v309_v0, %s399_s30  ;;  %v310_v2 = vsub.f32 %v277_v50, %v309_v0 }
 0x516   :  { %v313_v1 = vpop.permute.xlu1 %312 }
 0x517   :  { %v315_v3 = vsub.f32 %v286_v48, %v313_v1 }
 0x519   :  { %v317_v4 = vsel %vm316_vm6, %v310_v2, %v315_v3 }
 0x51a   :  { %319 = vst.msk [vmem:[%s507_s9] sm:$0xff] %vm318_vm7, %v317_v4 }

</bundles_post_ra>
